<compile_context>
chip_gen: v7x
topology: tpu7x:2x2x1
jax: 0.10.0
libtpu: 0.0.40
codegen_flags: <defaults>
</compile_context>

<pallas_src>
import functools

import jax
import jax.numpy as jnp
from jax import lax
from jax.experimental import pallas as pl
from jax.experimental.pallas import tpu as pltpu


def _round_up(a, m):
    return (a + m - 1) // m * m


# --------------------------------------------------------------------------
# Stage 1: per-feature batch statistics of z = x @ W (reduction over batch).
# --------------------------------------------------------------------------
def _bn_stats_kernel(x_ref, w_ref, sum_ref, sumsq_ref):
    @pl.when(pl.program_id(0) == 0)
    def _():
        sum_ref[...] = jnp.zeros_like(sum_ref)
        sumsq_ref[...] = jnp.zeros_like(sumsq_ref)

    z = jnp.dot(x_ref[...], w_ref[...], preferred_element_type=jnp.float32)
    sum_ref[...] += jnp.sum(z, axis=0, keepdims=True)
    sumsq_ref[...] += jnp.sum(z * z, axis=0, keepdims=True)


def _bn_batch_stats(x_bf16, w_bf16, tile_n):
    n_pad, f_in = x_bf16.shape
    f_pad = w_bf16.shape[1]
    return pl.pallas_call(
        _bn_stats_kernel,
        out_shape=(jax.ShapeDtypeStruct((1, f_pad), jnp.float32),
                   jax.ShapeDtypeStruct((1, f_pad), jnp.float32)),
        grid_spec=pltpu.PrefetchScalarGridSpec(
            num_scalar_prefetch=0,
            grid=(n_pad // tile_n,),
            in_specs=[pl.BlockSpec((tile_n, f_in), lambda i: (i, 0)),
                      pl.BlockSpec((f_in, f_pad), lambda i: (0, 0))],
            out_specs=(pl.BlockSpec((1, f_pad), lambda i: (0, 0)),
                       pl.BlockSpec((1, f_pad), lambda i: (0, 0)))),
        compiler_params=pltpu.CompilerParams(
            dimension_semantics=("arbitrary",),
            vmem_limit_bytes=32 * 1024 * 1024),
    )(x_bf16, w_bf16)


# --------------------------------------------------------------------------
# Stage 2: out = dropout(ReLU(z * scale + shift)), fully parallel over batch.
# (scale/shift already fold BN affine, Linear bias and the 1/(1-p) factor.)
# --------------------------------------------------------------------------
def _apply_kernel(seed_ref, x_ref, w_ref, scale_ref, shift_ref, o_ref, *,
                  tile_n, f_pad, keep_threshold):
    z = jnp.dot(x_ref[...], w_ref[...], preferred_element_type=jnp.float32)
    y = jnp.maximum(z * scale_ref[...] + shift_ref[...], 0.0)

    if keep_threshold > 0:  # dropout enabled (static)
        row0 = (pl.program_id(0) * tile_n).astype(jnp.uint32)
        rows = lax.broadcasted_iota(jnp.uint32, y.shape, 0) + row0
        cols = lax.broadcasted_iota(jnp.uint32, y.shape, 1)
        h = rows * jnp.uint32(f_pad) + cols
        h = h + seed_ref[0].astype(jnp.uint32) * jnp.uint32(0x9E3779B9)
        # splitmix32-style finalizer (pure VPU int ops, works on TPU & interpret)
        h = h ^ (h >> 16)
        h = h * jnp.uint32(0x85EBCA6B)
        h = h ^ (h >> 13)
        h = h * jnp.uint32(0xC2B2AE35)
        h = h ^ (h >> 16)
        keep = h >= jnp.uint32(keep_threshold)   # integer-domain compare
        y = jnp.where(keep, y, 0.0)

    o_ref[...] = y.astype(o_ref.dtype)


def mlp_block(x, w, b, gamma=None, beta=None, *, seed=0, drop_p=0.1,
              use_bn=True, bn_eps=1e-5, tile_n=512):
    """Training-mode forward of MLPBlock.

    x: [N, F_IN] f32; w: [F_IN, F_OUT] (Linear weight transposed);
    b: [F_OUT]; gamma/beta: [F_OUT] (required if use_bn). Returns [N, F_OUT] f32.
    """
    n, f_in = x.shape
    f_out = w.shape[1]

    # ---- padding for lane-dense output & batch tiling ----------------------
    f_pad = _round_up(f_out, 128)
    tile_n = min(tile_n, _round_up(n, 16))   # 16-row multiple for bf16 sublanes
    n_pad = _round_up(n, tile_n)

    x_p = jnp.zeros((n_pad, f_in), jnp.bfloat16).at[:n, :].set(
        x.astype(jnp.bfloat16))
    w_p = jnp.zeros((f_in, f_pad), jnp.bfloat16).at[:, :f_out].set(
        w.astype(jnp.bfloat16))
    b_p = jnp.zeros((f_pad,), jnp.float32).at[:f_out].set(
        b.astype(jnp.float32))

    # ---- fold BN (batch stats) + bias into a per-feature affine ------------
    if use_bn:
        g_p = jnp.zeros((f_pad,), jnp.float32).at[:f_out].set(
            gamma.astype(jnp.float32))
        be_p = jnp.zeros((f_pad,), jnp.float32).at[:f_out].set(
            beta.astype(jnp.float32))
        zsum, zsumsq = _bn_batch_stats(x_p, w_p, tile_n)
        mean_z = zsum[0] / n                                   # true N, padded rows are 0
        var_z = jnp.maximum(zsumsq[0] / n - mean_z * mean_z, 0.0)  # biased var (PT train)
        rstd = lax.rsqrt(var_z + bn_eps)
        scale = g_p * rstd
        shift = be_p - mean_z * scale   # Linear bias cancels: y - mean_y == z - mean_z
    else:
        scale = jnp.ones((f_pad,), jnp.float32)
        shift = b_p

    # ---- fold inverted-dropout 1/(1-p) (ReLU commutes with positive scale) -
    if drop_p > 0.0:
        inv_keep = 1.0 / (1.0 - drop_p)
        scale = scale * inv_keep
        shift = shift * inv_keep
        keep_threshold = min(int(round(drop_p * (2 ** 32))), 2 ** 32 - 1)
    else:
        keep_threshold = 0

    scale = scale.reshape(1, f_pad)
    shift = shift.reshape(1, f_pad)
    seed_arr = jnp.asarray([seed], dtype=jnp.int32)

    kernel = functools.partial(_apply_kernel, tile_n=tile_n, f_pad=f_pad,
                               keep_threshold=keep_threshold)

    out = pl.pallas_call(
        kernel,
        out_shape=jax.ShapeDtypeStruct((n_pad, f_pad), jnp.float32),
        grid_spec=pltpu.PrefetchScalarGridSpec(
            num_scalar_prefetch=1,                 # seed -> SMEM
            grid=(n_pad // tile_n,),
            in_specs=[
                pl.BlockSpec((tile_n, f_in), lambda i, seed: (i, 0)),
                pl.BlockSpec((f_in, f_pad), lambda i, seed: (0, 0)),
                pl.BlockSpec((1, f_pad), lambda i, seed: (0, 0)),
                pl.BlockSpec((1, f_pad), lambda i, seed: (0, 0)),
            ],
            out_specs=pl.BlockSpec((tile_n, f_pad), lambda i, seed: (i, 0))),
        compiler_params=pltpu.CompilerParams(
            dimension_semantics=("parallel",),
            vmem_limit_bytes=32 * 1024 * 1024),
    )(seed_arr, x_p, w_p, scale, shift)

    return out[:n, :f_out]


if __name__ == "__main__":
    # MLPBlock(in_features=32, out_features=64, activation_fn=ReLU,
    #          drop_out=0.1, bn=True)
    N, F_IN, F_OUT = 8, 32, 64
    DROP_P = 0.1

    key = jax.random.PRNGKey(0)
    kx, kw = jax.random.split(key)
    x = jax.random.normal(kx, (N, F_IN), dtype=jnp.float32)

    # Parameter init matching initialize_weights():
    #   Linear.weight ~ xavier_normal (std = sqrt(2/(fan_in+fan_out))),
    #   Linear.bias = 0, BN gamma = 1, BN beta = 0.
    xavier_std = (2.0 / (F_IN + F_OUT)) ** 0.5
    w = jax.random.normal(kw, (F_IN, F_OUT), dtype=jnp.float32) * xavier_std
    b = jnp.zeros((F_OUT,), jnp.float32)
    gamma = jnp.ones((F_OUT,), jnp.float32)
    beta = jnp.zeros((F_OUT,), jnp.float32)

    out = mlp_block(x, w, b, gamma, beta, seed=0, drop_p=DROP_P, use_bn=True)
    out = jax.block_until_ready(out)

    assert out.shape == (N, F_OUT) and out.dtype == jnp.float32
    assert bool(jnp.all(jnp.isfinite(out)))
    print("KERNEL_OK")
</pallas_src>

<mosaic_0001>
module attributes {stable_mosaic.version = 11 : i64} {
  func.func @_bn_stats_kernel(%arg0: i32, %arg1: memref<16x32xbf16, #tpu.memory_space<vmem>>, %arg2: memref<32x128xbf16, #tpu.memory_space<vmem>>, %arg3: memref<1x128xf32, #tpu.memory_space<vmem>>, %arg4: memref<1x128xf32, #tpu.memory_space<vmem>>) attributes {dimension_semantics = [#tpu.dimension_semantics<arbitrary>], iteration_bounds = array<i64: 1>, scalar_prefetch = 0 : i64, scratch_operands = 0 : i64, tpu.core_type = #tpu.core_type<tc>, window_params = [{transform_indices = @transform_0, window_bounds = array<i64: 16, 32>}, {pipeline_mode = #tpu.pipeline_mode<synchronous>, transform_indices = @transform_1, window_bounds = array<i64: 32, 128>}, {pipeline_mode = #tpu.pipeline_mode<synchronous>, transform_indices = @transform_2, window_bounds = array<i64: 1, 128>}, {pipeline_mode = #tpu.pipeline_mode<synchronous>, transform_indices = @transform_3, window_bounds = array<i64: 1, 128>}]} {
    %c0_i32 = arith.constant 0 : i32
    %0 = arith.cmpi eq, %arg0, %c0_i32 : i32
    %1 = arith.extui %0 : i1 to i32
    %c0_i32_0 = arith.constant 0 : i32
    %2 = arith.cmpi ne, %1, %c0_i32_0 : i32
    scf.if %2 {
      %cst_14 = arith.constant 0.000000e+00 : f32
      %17 = vector.broadcast %cst_14 : f32 to vector<1x128xf32>
      %c0_15 = arith.constant 0 : index
      %c0_16 = arith.constant 0 : index
      %18 = vector.load %arg3[%c0_15, %c0_16] : memref<1x128xf32, #tpu.memory_space<vmem>>, vector<1x128xf32>
      tpu.vector_store %arg3[%c0_15, %c0_16], %17 {strides = array<i32>} : memref<1x128xf32, #tpu.memory_space<vmem>>, vector<1x128xf32>,
      %cst_17 = arith.constant 0.000000e+00 : f32
      %19 = vector.broadcast %cst_17 : f32 to vector<1x128xf32>
      %c0_18 = arith.constant 0 : index
      %c0_19 = arith.constant 0 : index
      %20 = vector.load %arg4[%c0_18, %c0_19] : memref<1x128xf32, #tpu.memory_space<vmem>>, vector<1x128xf32>
      tpu.vector_store %arg4[%c0_18, %c0_19], %19 {strides = array<i32>} : memref<1x128xf32, #tpu.memory_space<vmem>>, vector<1x128xf32>,
    } else {
    }
    %c0 = arith.constant 0 : index
    %c0_1 = arith.constant 0 : index
    %3 = vector.load %arg1[%c0, %c0_1] : memref<16x32xbf16, #tpu.memory_space<vmem>>, vector<16x32xbf16>
    %c0_2 = arith.constant 0 : index
    %c0_3 = arith.constant 0 : index
    %4 = vector.load %arg2[%c0_2, %c0_3] : memref<32x128xbf16, #tpu.memory_space<vmem>>, vector<32x128xbf16>
    %cst = arith.constant dense<0.000000e+00> : vector<16x128xf32>
    %5 = tpu.matmul %3, %4, %cst {dimension_numbers = #tpu.dot_dimension_numbers<[1], [0], [0], [1], [0, 0, 1, 1], [], []>} : vector<16x32xbf16>, vector<32x128xbf16>, vector<16x128xf32> -> vector<16x128xf32>
    %c0_4 = arith.constant 0 : index
    %c0_5 = arith.constant 0 : index
    %6 = vector.load %arg3[%c0_4, %c0_5] : memref<1x128xf32, #tpu.memory_space<vmem>>, vector<1x128xf32>
    %cst_6 = arith.constant dense<0.000000e+00> : vector<128xf32>
    %7 = vector.multi_reduction <add>, %5, %cst_6 [0] : vector<16x128xf32> to vector<128xf32>
    %8 = vector.shape_cast %7 : vector<128xf32> to vector<1x128xf32>
    %9 = arith.addf %6, %8 : vector<1x128xf32>
    %c0_7 = arith.constant 0 : index
    %c0_8 = arith.constant 0 : index
    %10 = vector.load %arg3[%c0_7, %c0_8] : memref<1x128xf32, #tpu.memory_space<vmem>>, vector<1x128xf32>
    tpu.vector_store %arg3[%c0_7, %c0_8], %9 {strides = array<i32>} : memref<1x128xf32, #tpu.memory_space<vmem>>, vector<1x128xf32>,
    %c0_9 = arith.constant 0 : index
    %c0_10 = arith.constant 0 : index
    %11 = vector.load %arg4[%c0_9, %c0_10] : memref<1x128xf32, #tpu.memory_space<vmem>>, vector<1x128xf32>
    %12 = arith.mulf %5, %5 : vector<16x128xf32>
    %cst_11 = arith.constant dense<0.000000e+00> : vector<128xf32>
    %13 = vector.multi_reduction <add>, %12, %cst_11 [0] : vector<16x128xf32> to vector<128xf32>
    %14 = vector.shape_cast %13 : vector<128xf32> to vector<1x128xf32>
    %15 = arith.addf %11, %14 : vector<1x128xf32>
    %c0_12 = arith.constant 0 : index
    %c0_13 = arith.constant 0 : index
    %16 = vector.load %arg4[%c0_12, %c0_13] : memref<1x128xf32, #tpu.memory_space<vmem>>, vector<1x128xf32>
    tpu.vector_store %arg4[%c0_12, %c0_13], %15 {strides = array<i32>} : memref<1x128xf32, #tpu.memory_space<vmem>>, vector<1x128xf32>,
    return
  }
  func.func @transform_0(%arg0: i32) -> (i32, i32) {
    %c0_i32 = arith.constant 0 : i32
    %c0_i32_0 = arith.constant 0 : i32
    return %arg0, %c0_i32 : i32, i32
  }
  func.func @transform_1(%arg0: i32) -> (i32, i32) {
    %c0_i32 = arith.constant 0 : i32
    %c0_i32_0 = arith.constant 0 : i32
    %c0_i32_1 = arith.constant 0 : i32
    return %c0_i32, %c0_i32_0 : i32, i32
  }
  func.func @transform_2(%arg0: i32) -> (i32, i32) {
    %c0_i32 = arith.constant 0 : i32
    %c0_i32_0 = arith.constant 0 : i32
    %c0_i32_1 = arith.constant 0 : i32
    return %c0_i32, %c0_i32_0 : i32, i32
  }
  func.func @transform_3(%arg0: i32) -> (i32, i32) {
    %c0_i32 = arith.constant 0 : i32
    %c0_i32_0 = arith.constant 0 : i32
    %c0_i32_1 = arith.constant 0 : i32
    return %c0_i32, %c0_i32_0 : i32, i32
  }
}

</mosaic_0001>

<bundles_post_ra>
// kernel: tpu_custom_call.1
= control target key start
LH: loop header
LB: loop body
LE: loop exit
PB: predicated region body
PF: predicated region fallthrough
CT: control target
= control target key end

     0   :  { %9 = vsyncpa [#allocation3], 0  ;;  %s376_s0 = inlined_call_operand.hbm [shape: bf16[16,32], index: 0, kind: input, shape index: {}]   ;;  %s377_s1 = inlined_call_operand.hbm [shape: bf16[32,128], index: 1, kind: input, shape index: {}]   ;;  %s378_s2 = inlined_call_operand.hbm [shape: f32[1,128], index: 2, kind: output, shape index: {0}]   ;;  %s379_s3 = inlined_call_operand.hbm [shape: f32[1,128], index: 3, kind: output, shape index: {1}]  }
   0x1   :  { %10 = vsyncpa [#allocation6], 0 }
   0x2   :  { %11 = vsyncpa [#allocation4], 0 }
   0x3   :  { %12 = vsyncpa [#allocation9], 0  ;;  %s292_s12 = smov [#allocation2]   ;;  %s196_s16 = scalar_lea.hbm %s376_s0, 128 }
   0x4   :  { %s18_s13 = sshll.u32 %s292_s12, 4  ;;  %p197_p0 = scmp.ne.s32.totalorder %s376_s0, %s196_s16  ;;  %s19_s13 = int_to_ptr.vmem [resolvable:$true] %s18_s13 }
   0x5   :  { %p200_p1 = scmp.lt.u32.totalorder %s196_s16, %s376_s0 }
   0x7   :  { %p202_p2 = pnand %p200_p1, %p197_p0 }
   0x9   :  { %205 = shalt.err (!%p202_p2)
}
   0xa   :  { %s206_s21 = scalar_lea.vmem %s19_s13, 128  ;;  %p211_p4 = scmp.lt.s32.totalorder %s19_s13, %s19_s13 }
   0xb   :  { %p207_p3 = scmp.ne.s32.totalorder %s19_s13, %s206_s21  ;;  %p212_p5 = scmp.lt.s32.totalorder %s206_s21, %s206_s21 }
   0xd   :  { %p213_p6 = por %p212_p5, %p211_p4 }
   0xf   :  { %p214_p7 = pnand %p213_p6, %p207_p3 }
  0x11   :  { %217 = shalt.err (!%p214_p7)
}
  0x12   :  { %s293_s22 = smov 64   ;;  %s294_s23 = smov 4  }
  0x13   :  { %24 = dma.hbm_to_vmem [thread:$0]  %s376_s0, 128, %s19_s13, [#allocation3], %s293_s22, %s293_s22, %s294_s23  }
  0x14   :  { %s295_s26 = smov [#allocation5]   ;;  %s218_s30 = scalar_lea.hbm %s377_s1, 256 }
  0x15   :  { %s30_s27 = sshll.u32 %s295_s26, 4  ;;  %p219_p8 = scmp.ne.s32.totalorder %s377_s1, %s218_s30  ;;  %s31_s27 = int_to_ptr.vmem [resolvable:$true] %s30_s27 }
  0x16   :  { %p222_p9 = scmp.lt.u32.totalorder %s218_s30, %s377_s1 }
  0x18   :  { %p224_p10 = pnand %p222_p9, %p219_p8 }
  0x1a   :  { %227 = shalt.err (!%p224_p10)
}
  0x1b   :  { %s228_s8 = scalar_lea.vmem %s31_s27, 256  ;;  %p233_p12 = scmp.lt.s32.totalorder %s31_s27, %s31_s27 }
  0x1c   :  { %p229_p11 = scmp.ne.s32.totalorder %s31_s27, %s228_s8  ;;  %p234_p13 = scmp.lt.s32.totalorder %s228_s8, %s228_s8 }
  0x1e   :  { %p235_p0 = por %p234_p13, %p233_p12 }
  0x20   :  { %p236_p1 = pnand %p235_p0, %p229_p11 }
  0x22   :  { %239 = shalt.err (!%p236_p1)
}
  0x23   :  { %36 = dma.hbm_to_vmem [thread:$0]  %s377_s1, 256, %s31_s27, [#allocation6], %s293_s22, %s293_s22, %s294_s23  }
  0x24   :  { %284 = dma.done.wait [#allocation3], 128  }
  0x25   :  { %285 = vsyncadd [#allocation3], 4294967168 }
  0x26   :  { %286 = dma.done.wait [#allocation6], 256  }
  0x27   :  { %287 = vsyncadd [#allocation6], 4294967040  ;;  %v296_v0 = vmov 0.0   ;;  %vm297_vm0 = vmmov 0   ;;  %v193_v1 = vld [vmem:[#allocation5] sm:$0xff]   ;;  %v194_v2 = vld [vmem:[#allocation5 + $0x8] sm:$0xff]  }
  0x28   :  { %177 = vmatprep.subr.bf16.mxu0 %v296_v0  ;;  %48 = vst [vmem:[#allocation7] sm:$0x1] %v296_v0  ;;  %49 = vst [vmem:[#allocation8] sm:$0x1] %v296_v0  ;;  %181 = vmatprep.mubr.msk.bf16.mxu0 %vm297_vm0, %v296_v0  ;;  %v195_v3 = vld [vmem:[#allocation2] sm:$0xff]   ;;  %vm73_vm1 = vcmask 261120  }
  0x29   :  { %178 = vmatpush3.bf16.msra.mxu0 %v193_v1  ;;  %s298_s1 = smov [#allocation7]   ;;  %s299_s11 = smov [#allocation8]  }
  0x2a   :  { %179 = vmatprep.subr.bf16.mxu0 %v296_v0  ;;  %s146_s10 = sshll.u32 %s298_s1, 4  ;;  %s156_s12 = sshll.u32 %s299_s11, 4  ;;  %s147_s10 = int_to_ptr.vmem [resolvable:$true] %s146_s10  ;;  %s344_s12 = int_to_ptr.vmem [resolvable:$true] %s156_s12 }
  0x2b   :  { %s240_s13 = scalar_lea.vmem %s147_s10, 16  ;;  %s244_s14 = scalar_lea.vmem %s147_s10, 32 }
  0x2c   :  { %p241_p2 = scmp.ne.s32.totalorder %s147_s10, %s240_s13  ;;  %p245_p3 = scmp.lt.s32.totalorder %s147_s10, %s147_s10 }
  0x2d   :  { %180 = vmatpush3.bf16.msra.mxu0 %v194_v2  ;;  %p246_p4 = scmp.lt.s32.totalorder %s244_s14, %s240_s13 }
  0x2f   :  { %v118_v21 = vld [vmem:[#allocation7] sm:$0x1]  ;;  %v128_v24 = vld [vmem:[#allocation8] sm:$0x1]  ;;  %p247_p5 = por %p246_p4, %p245_p3 }
  0x30   :  { %182 = vmatmul.mubr.msk.bf16.vlgmr.msra.gmra.mrb[0].mxu0 %vm73_vm1, %v195_v3 }
  0x31   :  { %p248_p6 = pnand %p247_p5, %p241_p2 }
 0x103   :  { %v111_v4 = vpop.f32.mrb[0].mxu0 }
 0x104   :  { %v183_v5 = vpop.f32.mrb[1].mxu0  ;;  %v129_v7 = vmul.f32 %v111_v4, %v111_v4 }
 0x105   :  { %v114_v6 = vpop.f32.mrb[2].mxu0 }
 0x106   :  { %v119_v8 = vadd.f32 %v114_v6, %v111_v4  ;;  %v130_v9 = vmul.f32 %v114_v6, %v114_v6  ;;  %v184_v10 = vpop.f32.mrb[3].mxu0 }
 0x108   :  { %v120_v11 = vrot.slane %v119_v8, 4  ;;  %v131_v12 = vadd.f32 %v130_v9, %v129_v7 }
 0x10a   :  { %v121_v13 = vadd.f32 %v120_v11, %v119_v8  ;;  %v132_v14 = vrot.slane %v131_v12, 4 }
 0x10c   :  { %v122_v15 = vrot.slane %v121_v13, 2  ;;  %v133_v16 = vadd.f32 %v132_v14, %v131_v12 }
 0x10e   :  { %v123_v17 = vadd.f32 %v122_v15, %v121_v13  ;;  %v134_v18 = vrot.slane %v133_v16, 2 }
 0x110   :  { %v124_v19 = vrot.slane %v123_v17, 1  ;;  %v135_v20 = vadd.f32 %v134_v18, %v133_v16 }
 0x112   :  { %v125_v22 = vadd.f32 %v124_v19, %v123_v17  ;;  %v136_v23 = vrot.slane %v135_v20, 1 }
 0x114   :  { %v126_v25 = vadd.f32 %v125_v22, %v118_v21  ;;  %v137_v26 = vadd.f32 %v136_v23, %v135_v20 }
 0x116   :  { %127 = vst [vmem:[#allocation7] sm:$0x1] %v126_v25  ;;  %v138_v27 = vadd.f32 %v137_v26, %v128_v24 }
 0x117   :  { %251 = shalt.err (!%p248_p6)
}
 0x118   :  { %s252_s17 = scalar_lea.hbm %s378_s2, 16 }
 0x119   :  { %p253_p7 = scmp.ne.s32.totalorder %s378_s2, %s252_s17  ;;  %p256_p8 = scmp.lt.u32.totalorder %s252_s17, %s378_s2 }
 0x11b   :  { %p258_p9 = pnand %p256_p8, %p253_p7 }
 0x11d   :  { %261 = shalt.err (!%p258_p9)
}
 0x11e   :  { %149 = dma.vmem_to_hbm [thread:$0]  %s147_s10, 16, %s378_s2, [#allocation4]   ;;  %139 = vst [vmem:[#allocation8] sm:$0x1] %v138_v27 }
 0x11f   :  { %s262_s24 = scalar_lea.vmem %s344_s12, 16  ;;  %s266_s25 = scalar_lea.vmem %s344_s12, 32 }
 0x120   :  { %p263_p10 = scmp.ne.s32.totalorder %s344_s12, %s262_s24  ;;  %p267_p11 = scmp.lt.s32.totalorder %s344_s12, %s344_s12 }
 0x121   :  { %p268_p12 = scmp.lt.s32.totalorder %s266_s25, %s262_s24 }
 0x123   :  { %p269_p13 = por %p268_p12, %p267_p11 }
 0x125   :  { %p270_p0 = pnand %p269_p13, %p263_p10 }
 0x127   :  { %273 = shalt.err (!%p270_p0)
}
 0x128   :  { %s274_s28 = scalar_lea.hbm %s379_s3, 16 }
 0x129   :  { %p275_p1 = scmp.ne.s32.totalorder %s379_s3, %s274_s28  ;;  %p278_p2 = scmp.lt.u32.totalorder %s274_s28, %s379_s3 }
 0x12b   :  { %p280_p3 = pnand %p278_p2, %p275_p1 }
 0x12d   :  { %283 = shalt.err (!%p280_p3)
}
 0x12e   :  { %159 = dma.vmem_to_hbm [thread:$0]  %s344_s12, 16, %s379_s3, [#allocation9]  }
 0x12f   :  { %288 = dma.done.wait [#allocation4], 16  }
 0x130   :  { %289 = vsyncadd [#allocation4], 4294967280 }
 0x131   :  { %290 = dma.done.wait [#allocation9], 16  }
 0x132   :  { %291 = vsyncadd [#allocation9], 4294967280 }
 0x133   :  { %166 = vsyncpa [#allocation3], 1 }
 0x134   :  { %167 = vsyncpa [#allocation6], 1 }
 0x135   :  { %168 = vsyncpa [#allocation4], 1 }
 0x136   :  { %169 = vsyncpa [#allocation9], 1 }

</bundles_post_ra>
